<compile_context>
chip_gen: v6e
topology: v6e:2x2x1
jax: 0.10.0
libtpu: 0.0.40
codegen_flags: <defaults>
</compile_context>

<pallas_src>
import jax
import jax.numpy as jnp
from jax.experimental import pallas as pl
from jax.experimental.pallas import tpu as pltpu


def _residual_conv1x1_kernel(x_ref, w_ref, b_ref, o_ref):
    # x_ref / o_ref : (C, TSUB, 128) VMEM blocks (batch dim squeezed by BlockSpec)
    # w_ref         : (C, C) f32 in SMEM   (PyTorch conv1x1 weight, [c_out, c_in])
    # b_ref         : (C,)   f32 in SMEM
    C = x_ref.shape[0]
    x = x_ref[...].astype(jnp.float32)               # one dense (C, TSUB, 128) load
    for o in range(C):                                # static unroll: C is small
        acc = x[0] * w_ref[o, 0]                      # scalar * full (TSUB,128) slab (VPU)
        for c in range(1, C):
            acc = acc + x[c] * w_ref[o, c]
        acc = acc + b_ref[o] + x[o]                   # bias + fused residual add
        o_ref[o] = acc.astype(o_ref.dtype)            # direct per-channel unmasked store


def residual_conv1x1(x_nchw, weight, bias):
    """Residual(Conv1x1): conv1x1(x) + x, fused in one Pallas pass.

    x_nchw : (N, C, H, W)
    weight : (C, C)  (1x1 conv kernel, squeezed; y[o] = sum_c w[o,c] x[c] + b[o])
    bias   : (C,)
    """
    N, C, H, W = x_nchw.shape
    S = H * W
    itemsize = jnp.dtype(x_nchw.dtype).itemsize

    # ---- sublane-dense layout: (N, C, S//128, 128), pad S to a multiple of 128 ----
    S_pad = ((S + 127) // 128) * 128
    x3d = x_nchw.reshape(N, C, S)
    if S_pad != S:
        x3d = jnp.pad(x3d, ((0, 0), (0, 0), (0, S_pad - S)))
    S128 = S_pad // 128
    x4d = x3d.reshape(N, C, S128, 128)

    # ---- generation-aware block sizing (v7x: 64 MiB VMEM, v5e/v6e: 128 MiB) ----
    try:
        vmem_cap = int(pltpu.get_tpu_info().vmem_capacity_bytes)
    except Exception:
        vmem_cap = 64 * 1024 * 1024                   # conservative (v7x-sized) fallback
    vmem_limit = min(vmem_cap * 3 // 4, 96 * 1024 * 1024)   # ~48 MiB v7x / ~96 MiB v5e,v6e
    # in + out, each double-buffered (~4x block), plus headroom for internal scratch.
    target_block_bytes = max(vmem_limit // 6, 1 << 20)
    tsub = target_block_bytes // (C * 128 * itemsize)
    tsub = max((tsub // 16) * 16, 8)                  # multiple of 16 covers f32 and bf16
    if tsub >= S128:
        tsub = S128                                   # full extent is always a legal block
    num_tiles = pl.cdiv(S128, tsub)
    # Keep >= 2 grid steps on a parallel axis (v7x has 2 TensorCores per chip).
    if N * num_tiles < 2 and S128 >= 16:
        tsub = max(((S128 // 2) // 8) * 8, 8)
        num_tiles = pl.cdiv(S128, tsub)
    grid = (N, num_tiles)

    cost = pl.CostEstimate(
        flops=2 * N * S * C * C + 2 * N * S * C,      # channel mix + bias + residual
        transcendentals=0,
        bytes_accessed=2 * N * C * S * itemsize + (C * C + C) * 4,
    )

    out4d = pl.pallas_call(
        _residual_conv1x1_kernel,
        out_shape=jax.ShapeDtypeStruct((N, C, S128, 128), x_nchw.dtype),
        grid_spec=pl.GridSpec(
            grid=grid,
            in_specs=[
                # batch squeezed (None); C full; (TSUB, 128) sublane/lane-dense tile
                pl.BlockSpec((None, C, tsub, 128), lambda n, s: (n, 0, s, 0)),
                pl.BlockSpec(memory_space=pltpu.MemorySpace.SMEM),   # weight (C, C)
                pl.BlockSpec(memory_space=pltpu.MemorySpace.SMEM),   # bias (C,)
            ],
            out_specs=pl.BlockSpec((None, C, tsub, 128), lambda n, s: (n, 0, s, 0)),
        ),
        compiler_params=pltpu.CompilerParams(
            dimension_semantics=("parallel", "parallel"),
            vmem_limit_bytes=int(vmem_limit),
        ),
        cost_estimate=cost,
    )(x4d, weight.astype(jnp.float32), bias.astype(jnp.float32))

    out3d = out4d.reshape(N, C, S_pad)
    if S_pad != S:
        out3d = out3d[:, :, :S]
    return out3d.reshape(N, C, H, W)


if __name__ == "__main__":
    key = jax.random.PRNGKey(0)
    kx, kw, kb = jax.random.split(key, 3)

    N, C, H, W = 2, 4, 16, 16
    x = jax.random.normal(kx, (N, C, H, W), dtype=jnp.float32)
    # deterministic parameters for the representative fn (1x1 conv)
    weight = jax.random.normal(kw, (C, C), dtype=jnp.float32) * 0.1
    bias = jax.random.normal(kb, (C,), dtype=jnp.float32) * 0.1

    out = residual_conv1x1(x, weight, bias)
    out = jax.block_until_ready(out)

    # reference: fn(x) + x with fn = 1x1 conv (pure JAX)
    ref = jnp.einsum("nchw,oc->nohw", x, weight) + bias[None, :, None, None] + x
    assert out.shape == (N, C, H, W)
    assert jnp.allclose(out, ref, atol=1e-5, rtol=1e-5)

    print("KERNEL_OK")
</pallas_src>

<mosaic_0001>
module attributes {stable_mosaic.version = 11 : i64} {
  func.func @_residual_conv1x1_kernel(%arg0: i32, %arg1: i32, %arg2: memref<1x4x2x128xf32, #tpu.memory_space<vmem>>, %arg3: memref<4x4xf32, #tpu.memory_space<smem>>, %arg4: memref<4xf32, #tpu.memory_space<smem>>, %arg5: memref<1x4x2x128xf32, #tpu.memory_space<vmem>>) attributes {dimension_semantics = [#tpu.dimension_semantics<parallel>, #tpu.dimension_semantics<parallel>], iteration_bounds = array<i64: 2, 1>, scalar_prefetch = 0 : i64, scratch_operands = 0 : i64, tpu.core_type = #tpu.core_type<tc>, window_params = [{transform_indices = @transform_0, window_bounds = array<i64: 1, 4, 2, 128>}, {transform_indices = @transform_1, window_bounds = array<i64: 4, 4>}, {transform_indices = @transform_2, window_bounds = array<i64: 4>}, {transform_indices = @transform_3, window_bounds = array<i64: 1, 4, 2, 128>}]} {
    %c0 = arith.constant 0 : index
    %c0_0 = arith.constant 0 : index
    %c0_1 = arith.constant 0 : index
    %c0_2 = arith.constant 0 : index
    %0 = vector.load %arg2[%c0, %c0_0, %c0_1, %c0_2] : memref<1x4x2x128xf32, #tpu.memory_space<vmem>>, vector<1x4x2x128xf32>
    %1 = vector.shape_cast %0 : vector<1x4x2x128xf32> to vector<4x2x128xf32>
    %2 = vector.extract_strided_slice %1 {offsets = [0, 0, 0], sizes = [1, 2, 128], strides = [1, 1, 1]} : vector<4x2x128xf32> to vector<1x2x128xf32>
    %3 = vector.shape_cast %2 : vector<1x2x128xf32> to vector<2x128xf32>
    %c0_3 = arith.constant 0 : index
    %c0_4 = arith.constant 0 : index
    %4 = memref.load %arg3[%c0_3, %c0_4] : memref<4x4xf32, #tpu.memory_space<smem>>
    %5 = vector.broadcast %4 : f32 to vector<2x128xf32>
    %6 = arith.mulf %3, %5 : vector<2x128xf32>
    %7 = vector.extract_strided_slice %1 {offsets = [1, 0, 0], sizes = [1, 2, 128], strides = [1, 1, 1]} : vector<4x2x128xf32> to vector<1x2x128xf32>
    %8 = vector.shape_cast %7 : vector<1x2x128xf32> to vector<2x128xf32>
    %c0_5 = arith.constant 0 : index
    %c1 = arith.constant 1 : index
    %9 = memref.load %arg3[%c0_5, %c1] : memref<4x4xf32, #tpu.memory_space<smem>>
    %10 = vector.broadcast %9 : f32 to vector<2x128xf32>
    %11 = arith.mulf %8, %10 : vector<2x128xf32>
    %12 = arith.addf %6, %11 : vector<2x128xf32>
    %13 = vector.extract_strided_slice %1 {offsets = [2, 0, 0], sizes = [1, 2, 128], strides = [1, 1, 1]} : vector<4x2x128xf32> to vector<1x2x128xf32>
    %14 = vector.shape_cast %13 : vector<1x2x128xf32> to vector<2x128xf32>
    %c0_6 = arith.constant 0 : index
    %c2 = arith.constant 2 : index
    %15 = memref.load %arg3[%c0_6, %c2] : memref<4x4xf32, #tpu.memory_space<smem>>
    %16 = vector.broadcast %15 : f32 to vector<2x128xf32>
    %17 = arith.mulf %14, %16 : vector<2x128xf32>
    %18 = arith.addf %12, %17 : vector<2x128xf32>
    %19 = vector.extract_strided_slice %1 {offsets = [3, 0, 0], sizes = [1, 2, 128], strides = [1, 1, 1]} : vector<4x2x128xf32> to vector<1x2x128xf32>
    %20 = vector.shape_cast %19 : vector<1x2x128xf32> to vector<2x128xf32>
    %c0_7 = arith.constant 0 : index
    %c3 = arith.constant 3 : index
    %21 = memref.load %arg3[%c0_7, %c3] : memref<4x4xf32, #tpu.memory_space<smem>>
    %22 = vector.broadcast %21 : f32 to vector<2x128xf32>
    %23 = arith.mulf %20, %22 : vector<2x128xf32>
    %24 = arith.addf %18, %23 : vector<2x128xf32>
    %c0_8 = arith.constant 0 : index
    %25 = memref.load %arg4[%c0_8] : memref<4xf32, #tpu.memory_space<smem>>
    %26 = vector.broadcast %25 : f32 to vector<2x128xf32>
    %27 = arith.addf %24, %26 : vector<2x128xf32>
    %28 = vector.extract_strided_slice %1 {offsets = [0, 0, 0], sizes = [1, 2, 128], strides = [1, 1, 1]} : vector<4x2x128xf32> to vector<1x2x128xf32>
    %29 = vector.shape_cast %28 : vector<1x2x128xf32> to vector<2x128xf32>
    %30 = arith.addf %27, %29 : vector<2x128xf32>
    %c0_9 = arith.constant 0 : index
    %c0_10 = arith.constant 0 : index
    %c0_11 = arith.constant 0 : index
    %c0_12 = arith.constant 0 : index
    %31 = vector.load %arg5[%c0_9, %c0_10, %c0_11, %c0_12] : memref<1x4x2x128xf32, #tpu.memory_space<vmem>>, vector<1x1x2x128xf32>
    %32 = vector.shape_cast %31 : vector<1x1x2x128xf32> to vector<2x128xf32>
    %33 = vector.shape_cast %30 : vector<2x128xf32> to vector<1x1x2x128xf32>
    tpu.vector_store %arg5[%c0_9, %c0_10, %c0_11, %c0_12], %33 {strides = array<i32>} : memref<1x4x2x128xf32, #tpu.memory_space<vmem>>, vector<1x1x2x128xf32>,
    %34 = vector.extract_strided_slice %1 {offsets = [0, 0, 0], sizes = [1, 2, 128], strides = [1, 1, 1]} : vector<4x2x128xf32> to vector<1x2x128xf32>
    %35 = vector.shape_cast %34 : vector<1x2x128xf32> to vector<2x128xf32>
    %c1_13 = arith.constant 1 : index
    %c0_14 = arith.constant 0 : index
    %36 = memref.load %arg3[%c1_13, %c0_14] : memref<4x4xf32, #tpu.memory_space<smem>>
    %37 = vector.broadcast %36 : f32 to vector<2x128xf32>
    %38 = arith.mulf %35, %37 : vector<2x128xf32>
    %39 = vector.extract_strided_slice %1 {offsets = [1, 0, 0], sizes = [1, 2, 128], strides = [1, 1, 1]} : vector<4x2x128xf32> to vector<1x2x128xf32>
    %40 = vector.shape_cast %39 : vector<1x2x128xf32> to vector<2x128xf32>
    %c1_15 = arith.constant 1 : index
    %c1_16 = arith.constant 1 : index
    %41 = memref.load %arg3[%c1_15, %c1_16] : memref<4x4xf32, #tpu.memory_space<smem>>
    %42 = vector.broadcast %41 : f32 to vector<2x128xf32>
    %43 = arith.mulf %40, %42 : vector<2x128xf32>
    %44 = arith.addf %38, %43 : vector<2x128xf32>
    %45 = vector.extract_strided_slice %1 {offsets = [2, 0, 0], sizes = [1, 2, 128], strides = [1, 1, 1]} : vector<4x2x128xf32> to vector<1x2x128xf32>
    %46 = vector.shape_cast %45 : vector<1x2x128xf32> to vector<2x128xf32>
    %c1_17 = arith.constant 1 : index
    %c2_18 = arith.constant 2 : index
    %47 = memref.load %arg3[%c1_17, %c2_18] : memref<4x4xf32, #tpu.memory_space<smem>>
    %48 = vector.broadcast %47 : f32 to vector<2x128xf32>
    %49 = arith.mulf %46, %48 : vector<2x128xf32>
    %50 = arith.addf %44, %49 : vector<2x128xf32>
    %51 = vector.extract_strided_slice %1 {offsets = [3, 0, 0], sizes = [1, 2, 128], strides = [1, 1, 1]} : vector<4x2x128xf32> to vector<1x2x128xf32>
    %52 = vector.shape_cast %51 : vector<1x2x128xf32> to vector<2x128xf32>
    %c1_19 = arith.constant 1 : index
    %c3_20 = arith.constant 3 : index
    %53 = memref.load %arg3[%c1_19, %c3_20] : memref<4x4xf32, #tpu.memory_space<smem>>
    %54 = vector.broadcast %53 : f32 to vector<2x128xf32>
    %55 = arith.mulf %52, %54 : vector<2x128xf32>
    %56 = arith.addf %50, %55 : vector<2x128xf32>
    %c1_21 = arith.constant 1 : index
    %57 = memref.load %arg4[%c1_21] : memref<4xf32, #tpu.memory_space<smem>>
    %58 = vector.broadcast %57 : f32 to vector<2x128xf32>
    %59 = arith.addf %56, %58 : vector<2x128xf32>
    %60 = vector.extract_strided_slice %1 {offsets = [1, 0, 0], sizes = [1, 2, 128], strides = [1, 1, 1]} : vector<4x2x128xf32> to vector<1x2x128xf32>
    %61 = vector.shape_cast %60 : vector<1x2x128xf32> to vector<2x128xf32>
    %62 = arith.addf %59, %61 : vector<2x128xf32>
    %c0_22 = arith.constant 0 : index
    %c1_23 = arith.constant 1 : index
    %c0_24 = arith.constant 0 : index
    %c0_25 = arith.constant 0 : index
    %63 = vector.load %arg5[%c0_22, %c1_23, %c0_24, %c0_25] : memref<1x4x2x128xf32, #tpu.memory_space<vmem>>, vector<1x1x2x128xf32>
    %64 = vector.shape_cast %63 : vector<1x1x2x128xf32> to vector<2x128xf32>
    %65 = vector.shape_cast %62 : vector<2x128xf32> to vector<1x1x2x128xf32>
    tpu.vector_store %arg5[%c0_22, %c1_23, %c0_24, %c0_25], %65 {strides = array<i32>} : memref<1x4x2x128xf32, #tpu.memory_space<vmem>>, vector<1x1x2x128xf32>,
    %66 = vector.extract_strided_slice %1 {offsets = [0, 0, 0], sizes = [1, 2, 128], strides = [1, 1, 1]} : vector<4x2x128xf32> to vector<1x2x128xf32>
    %67 = vector.shape_cast %66 : vector<1x2x128xf32> to vector<2x128xf32>
    %c2_26 = arith.constant 2 : index
    %c0_27 = arith.constant 0 : index
    %68 = memref.load %arg3[%c2_26, %c0_27] : memref<4x4xf32, #tpu.memory_space<smem>>
    %69 = vector.broadcast %68 : f32 to vector<2x128xf32>
    %70 = arith.mulf %67, %69 : vector<2x128xf32>
    %71 = vector.extract_strided_slice %1 {offsets = [1, 0, 0], sizes = [1, 2, 128], strides = [1, 1, 1]} : vector<4x2x128xf32> to vector<1x2x128xf32>
    %72 = vector.shape_cast %71 : vector<1x2x128xf32> to vector<2x128xf32>
    %c2_28 = arith.constant 2 : index
    %c1_29 = arith.constant 1 : index
    %73 = memref.load %arg3[%c2_28, %c1_29] : memref<4x4xf32, #tpu.memory_space<smem>>
    %74 = vector.broadcast %73 : f32 to vector<2x128xf32>
    %75 = arith.mulf %72, %74 : vector<2x128xf32>
    %76 = arith.addf %70, %75 : vector<2x128xf32>
    %77 = vector.extract_strided_slice %1 {offsets = [2, 0, 0], sizes = [1, 2, 128], strides = [1, 1, 1]} : vector<4x2x128xf32> to vector<1x2x128xf32>
    %78 = vector.shape_cast %77 : vector<1x2x128xf32> to vector<2x128xf32>
    %c2_30 = arith.constant 2 : index
    %c2_31 = arith.constant 2 : index
    %79 = memref.load %arg3[%c2_30, %c2_31] : memref<4x4xf32, #tpu.memory_space<smem>>
    %80 = vector.broadcast %79 : f32 to vector<2x128xf32>
    %81 = arith.mulf %78, %80 : vector<2x128xf32>
    %82 = arith.addf %76, %81 : vector<2x128xf32>
    %83 = vector.extract_strided_slice %1 {offsets = [3, 0, 0], sizes = [1, 2, 128], strides = [1, 1, 1]} : vector<4x2x128xf32> to vector<1x2x128xf32>
    %84 = vector.shape_cast %83 : vector<1x2x128xf32> to vector<2x128xf32>
    %c2_32 = arith.constant 2 : index
    %c3_33 = arith.constant 3 : index
    %85 = memref.load %arg3[%c2_32, %c3_33] : memref<4x4xf32, #tpu.memory_space<smem>>
    %86 = vector.broadcast %85 : f32 to vector<2x128xf32>
    %87 = arith.mulf %84, %86 : vector<2x128xf32>
    %88 = arith.addf %82, %87 : vector<2x128xf32>
    %c2_34 = arith.constant 2 : index
    %89 = memref.load %arg4[%c2_34] : memref<4xf32, #tpu.memory_space<smem>>
    %90 = vector.broadcast %89 : f32 to vector<2x128xf32>
    %91 = arith.addf %88, %90 : vector<2x128xf32>
    %92 = vector.extract_strided_slice %1 {offsets = [2, 0, 0], sizes = [1, 2, 128], strides = [1, 1, 1]} : vector<4x2x128xf32> to vector<1x2x128xf32>
    %93 = vector.shape_cast %92 : vector<1x2x128xf32> to vector<2x128xf32>
    %94 = arith.addf %91, %93 : vector<2x128xf32>
    %c0_35 = arith.constant 0 : index
    %c2_36 = arith.constant 2 : index
    %c0_37 = arith.constant 0 : index
    %c0_38 = arith.constant 0 : index
    %95 = vector.load %arg5[%c0_35, %c2_36, %c0_37, %c0_38] : memref<1x4x2x128xf32, #tpu.memory_space<vmem>>, vector<1x1x2x128xf32>
    %96 = vector.shape_cast %95 : vector<1x1x2x128xf32> to vector<2x128xf32>
    %97 = vector.shape_cast %94 : vector<2x128xf32> to vector<1x1x2x128xf32>
    tpu.vector_store %arg5[%c0_35, %c2_36, %c0_37, %c0_38], %97 {strides = array<i32>} : memref<1x4x2x128xf32, #tpu.memory_space<vmem>>, vector<1x1x2x128xf32>,
    %98 = vector.extract_strided_slice %1 {offsets = [0, 0, 0], sizes = [1, 2, 128], strides = [1, 1, 1]} : vector<4x2x128xf32> to vector<1x2x128xf32>
    %99 = vector.shape_cast %98 : vector<1x2x128xf32> to vector<2x128xf32>
    %c3_39 = arith.constant 3 : index
    %c0_40 = arith.constant 0 : index
    %100 = memref.load %arg3[%c3_39, %c0_40] : memref<4x4xf32, #tpu.memory_space<smem>>
    %101 = vector.broadcast %100 : f32 to vector<2x128xf32>
    %102 = arith.mulf %99, %101 : vector<2x128xf32>
    %103 = vector.extract_strided_slice %1 {offsets = [1, 0, 0], sizes = [1, 2, 128], strides = [1, 1, 1]} : vector<4x2x128xf32> to vector<1x2x128xf32>
    %104 = vector.shape_cast %103 : vector<1x2x128xf32> to vector<2x128xf32>
    %c3_41 = arith.constant 3 : index
    %c1_42 = arith.constant 1 : index
    %105 = memref.load %arg3[%c3_41, %c1_42] : memref<4x4xf32, #tpu.memory_space<smem>>
    %106 = vector.broadcast %105 : f32 to vector<2x128xf32>
    %107 = arith.mulf %104, %106 : vector<2x128xf32>
    %108 = arith.addf %102, %107 : vector<2x128xf32>
    %109 = vector.extract_strided_slice %1 {offsets = [2, 0, 0], sizes = [1, 2, 128], strides = [1, 1, 1]} : vector<4x2x128xf32> to vector<1x2x128xf32>
    %110 = vector.shape_cast %109 : vector<1x2x128xf32> to vector<2x128xf32>
    %c3_43 = arith.constant 3 : index
    %c2_44 = arith.constant 2 : index
    %111 = memref.load %arg3[%c3_43, %c2_44] : memref<4x4xf32, #tpu.memory_space<smem>>
    %112 = vector.broadcast %111 : f32 to vector<2x128xf32>
    %113 = arith.mulf %110, %112 : vector<2x128xf32>
    %114 = arith.addf %108, %113 : vector<2x128xf32>
    %115 = vector.extract_strided_slice %1 {offsets = [3, 0, 0], sizes = [1, 2, 128], strides = [1, 1, 1]} : vector<4x2x128xf32> to vector<1x2x128xf32>
    %116 = vector.shape_cast %115 : vector<1x2x128xf32> to vector<2x128xf32>
    %c3_45 = arith.constant 3 : index
    %c3_46 = arith.constant 3 : index
    %117 = memref.load %arg3[%c3_45, %c3_46] : memref<4x4xf32, #tpu.memory_space<smem>>
    %118 = vector.broadcast %117 : f32 to vector<2x128xf32>
    %119 = arith.mulf %116, %118 : vector<2x128xf32>
    %120 = arith.addf %114, %119 : vector<2x128xf32>
    %c3_47 = arith.constant 3 : index
    %121 = memref.load %arg4[%c3_47] : memref<4xf32, #tpu.memory_space<smem>>
    %122 = vector.broadcast %121 : f32 to vector<2x128xf32>
    %123 = arith.addf %120, %122 : vector<2x128xf32>
    %124 = vector.extract_strided_slice %1 {offsets = [3, 0, 0], sizes = [1, 2, 128], strides = [1, 1, 1]} : vector<4x2x128xf32> to vector<1x2x128xf32>
    %125 = vector.shape_cast %124 : vector<1x2x128xf32> to vector<2x128xf32>
    %126 = arith.addf %123, %125 : vector<2x128xf32>
    %c0_48 = arith.constant 0 : index
    %c3_49 = arith.constant 3 : index
    %c0_50 = arith.constant 0 : index
    %c0_51 = arith.constant 0 : index
    %127 = vector.load %arg5[%c0_48, %c3_49, %c0_50, %c0_51] : memref<1x4x2x128xf32, #tpu.memory_space<vmem>>, vector<1x1x2x128xf32>
    %128 = vector.shape_cast %127 : vector<1x1x2x128xf32> to vector<2x128xf32>
    %129 = vector.shape_cast %126 : vector<2x128xf32> to vector<1x1x2x128xf32>
    tpu.vector_store %arg5[%c0_48, %c3_49, %c0_50, %c0_51], %129 {strides = array<i32>} : memref<1x4x2x128xf32, #tpu.memory_space<vmem>>, vector<1x1x2x128xf32>,
    return
  }
  func.func @transform_0(%arg0: i32, %arg1: i32) -> (i32, i32, i32, i32) {
    %c0_i32 = arith.constant 0 : i32
    %c0_i32_0 = arith.constant 0 : i32
    %c0_i32_1 = arith.constant 0 : i32
    return %arg0, %c0_i32, %arg1, %c0_i32_0 : i32, i32, i32, i32
  }
  func.func @transform_1(%arg0: i32, %arg1: i32) -> (i32, i32) {
    %c0_i32 = arith.constant 0 : i32
    %c0_i32_0 = arith.constant 0 : i32
    %c0_i32_1 = arith.constant 0 : i32
    return %c0_i32, %c0_i32_0 : i32, i32
  }
  func.func @transform_2(%arg0: i32, %arg1: i32) -> i32 {
    %c0_i32 = arith.constant 0 : i32
    %c0_i32_0 = arith.constant 0 : i32
    return %c0_i32 : i32
  }
  func.func @transform_3(%arg0: i32, %arg1: i32) -> (i32, i32, i32, i32) {
    %c0_i32 = arith.constant 0 : i32
    %c0_i32_0 = arith.constant 0 : i32
    %c0_i32_1 = arith.constant 0 : i32
    return %arg0, %c0_i32, %arg1, %c0_i32_0 : i32, i32, i32, i32
  }
}

</mosaic_0001>

<bundles_post_ra>
// kernel: tpu_custom_call.1
= control target key start
LH: loop header
LB: loop body
LE: loop exit
PB: predicated region body
PF: predicated region fallthrough
CT: control target
= control target key end

     0   :  { %s957_s0 = inlined_call_operand.hbm [shape: f32[2,4,2,128], index: 0, kind: input, shape index: {}]   ;;  %s958_s1 = inlined_call_operand.hbm [shape: f32[4,4], index: 1, kind: input, shape index: {}]   ;;  %s959_s2 = inlined_call_operand.vmem [shape: f32[4], index: 2, kind: input, shape index: {}]   ;;  %s960_s3 = inlined_call_operand.hbm [shape: f32[2,4,2,128], index: 3, kind: output, shape index: {}]  }
   0x1   :  { %962 = sst [smem:[#allocation14_spill]] %s958_s1 }
   0x2   :  { %8 = vsyncpa [#allocation3], 0 }
   0x3   :  { %10 = vsyncpa [#allocation3 + $0x1], 0 }
   0x4   :  { %11 = vsyncpa [#allocation5], 0 }
   0x5   :  { %12 = vsyncpa [#allocation6], 0 }
   0x6   :  { %13 = vsyncpa [#allocation4], 0 }
   0x7   :  { %15 = vsyncpa [#allocation4 + $0x1], 0  ;;  %s743_s12 = smov 0   ;;  %s745_s13 = smov 0  }
   0x8   :  { %s747_s14 = smov 0   ;;  %s749_s15 = smov 0  }
   0x9   :  { %s751_s16 = smov 0   ;;  %s753_s17 = smov 0  }
   0xa LB: > { %s442_s18 = sadd.s32 4294967295, %s713_s17   ;;  %s443_s19 = sadd.s32 4294967294, %s713_s17   ;;  %s713_s17 = sphi %s753_s17, %s21_s17   ;;  %s709_s16 = sphi %s751_s16, %s978_s16   ;;  %s705_s15 = sphi %s749_s15, %s977_s15   ;;  %s701_s14 = sphi %s747_s14, %s976_s14   ;;  %s697_s13 = sphi %s745_s13, %s975_s13   ;;  %s693_s12 = sphi %s743_s12, %s974_s12  }
   0xb   : > { %s42_s20 = sadd.s32 1, %s701_s14  ;;  %p49_p0 = scmp.ne.s32.totalorder %s701_s14, %s697_s13 }
   0xc   : > { %p50_p1 = scmp.eq.s32.totalorder %s713_s17, 0  ;;  %p55_p2 = scmp.ne.s32.totalorder %s697_s13, %s693_s12 }
   0xd   : > { %p781_p3 = scmp.eq.s32.totalorder %s442_s18, 0  ;;  %p123_p4 = scmp.eq.s32.totalorder %s442_s18, 1 }
   0xe   : > { %p51_p5 = por %p50_p1, %p49_p0  ;;  %p129_p6 = scmp.eq.s32.totalorder %s443_s19, 1 }
   0xf   : > { %p787_p7 = por %p781_p3, %p55_p2  ;;  %p791_p8 = por %p123_p4, %p49_p0 }
  0x10   : > { %p795_p9 = por %p129_p6, %p55_p2  ;;  %p444_p10 = scmp.ge.s32.totalorder %s713_s17, 1 }
  0x11   : > { %s965_s23 = scalar_select %p791_p8, 1, 0 }
  0x12   : > { %s966_s24 = scalar_select %p795_p9, 1, 0 }
  0x13   : > { %p136_p11 = scmp.lt.s32.totalorder %s713_s17, 3  ;;  %p513_p1 = scmp.lt.s32.totalorder %s713_s17, 2 }
  0x14   : > { %s158_s28 = sshll.u32 %s959_s2, 4  ;;  %s169_s4 = sand.u32 1, %s701_s14   ;;  %s159_s28 = int_to_ptr.vmem [resolvable:$true] %s158_s28 }
  0x15   : > { %p802_p13 = pnand %p444_p10, %p136_p11  ;;  %p812_p4 = pnand %p513_p1, %p51_p5 }
  0x16   : > { %s33_s5 = sadd.s32 1, %s709_s16  ;;  %s715_s6 = smov [#allocation7]  }
  0x17   : > { %p496_p0 = pneg %p802_p13  ;;  %s970_s1 = sld [smem:[#allocation14_spill]] }
  0x18   : > { %s582_s9 = scalar_lea.vmem %s159_s28, 16  ;;  %p590_p1 = scmp.lt.s32.totalorder %s159_s28, %s159_s28 }
  0x19   : > { %p818_p2 = pnand %p496_p0, %p781_p3  ;;  %p583_p5 = scmp.ne.s32.totalorder %s159_s28, %s582_s9 }
  0x1a   : > { %p591_p0 = scmp.lt.s32.totalorder %s582_s9, %s582_s9 }
  0x1b   : > { %p584_p6 = pneg %p818_p2 }
  0x1c   : > { %p592_p12 = por %p591_p0, %p590_p1 }
  0x1d   : > { %499 = dma.hbm_to_smem (!%p818_p2), %s970_s1, 64, %s715_s6, [#allocation5]  }
  0x1e   : > { %p585_p10 = pnand %p584_p6, %p583_p5 }
  0x20   : > { %p586_p11 = pneg %p585_p10 }
  0x22   : > { %p593_p9 = pnand %p592_p12, %p586_p11 }
  0x24   : > { %596 = shalt.err (!%p593_p9)
}
  0x25   : > { %s716_s10 = smov [#allocation8]   ;;  %p35_p8 = scmp.ge.s32.totalorder %s33_s5, 2 }
  0x26   : > { %502 = dma.vmem_to_smem (!%p818_p2), %s159_s28, 16, %s716_s10, [#allocation6]  }
  0x27   : > { %s448_s11 = sshll.u32 %s169_s4, 3  ;;  %s482_s18 = sshll.u32 %s709_s16, 7 }
  0x28   : > { %s980_s5 = smov (%p35_p8, %s33_s5), 0  ;;  %s180_s27 = scalar_lea.hbm %s957_s0, %s482_s18 }
  0x29   : > { %s37_s6 = ssub.s32 %s709_s16, %s980_s5  ;;  %s173_s7 = scalar_lea.vmem [#allocation2], %s448_s11 }
  0x2a   : > { %s181_s8 = sshll.u32 %s173_s7, 4  ;;  %p40_p9 = scmp.eq.s32.totalorder %s37_s6, 0  ;;  %s182_s8 = int_to_ptr.vmem [resolvable:$true] %s181_s8 }
  0x2b   : > { %s170_s9 = scalar_lea.sflag [#allocation3], %s169_s4  ;;  %p599_p12 = pneg %p812_p4 }
  0x2c   : > { %s844_s30 = scalar_select %p40_p9, %s701_s14, %s42_s20  }
  0x2d   : > { %s610_s28 = scalar_lea.vmem %s182_s8, 128  ;;  %s717_s10 = smov [#allocation2]  }
  0x2e   : > { %p611_p2 = scmp.ne.s32.totalorder %s182_s8, %s610_s28  ;;  %s615_s1 = sshll.u32 %s717_s10, 4  ;;  %s616_s1 = int_to_ptr.vmem [resolvable:$false] %s615_s1 }
  0x2f   : > { %s617_s19 = scalar_lea.vmem %s616_s1, 256  ;;  %p618_p6 = scmp.lt.s32.totalorder %s182_s8, %s616_s1 }
  0x30   : > { %p613_p8 = pnand %p611_p2, %p599_p12  ;;  %p619_p10 = scmp.lt.s32.totalorder %s617_s19, %s610_s28 }
  0x32   : > { %p614_p5 = pneg %p613_p8  ;;  %p620_p11 = por %p619_p10, %p618_p6 }
  0x34   : > { %p621_p1 = pnand %p620_p11, %p614_p5 }
  0x36   : > { %624 = shalt.err (!%p621_p1)
}
  0x37   : > { %s718_s11 = smov 32   ;;  %s719_s20 = smov 2  }
  0x38   : > { %506 = dma.hbm_to_vmem [thread:$0]  (!%p812_p4), %s180_s27, 128, %s182_s8, %s170_s9, %s718_s11, %s718_s11, %s719_s20  }
  0x39   : > { %193 = sbr.rel (%p802_p13) target bundleno = 118 (0x76), region = 32  ;;  %s853_s4 = sand.u32 (!%p802_p13), 1, %s697_s13  }
  0x3a   : > { %s452_s1 = sshll.u32 (!%p802_p13), %s853_s4, 3  ;;  %s196_s18 = scalar_lea.sflag (!%p802_p13), [#allocation3], %s853_s4 }
  0x3b   : > { %s199_s26 = scalar_lea.vmem (!%p802_p13), [#allocation2], %s452_s1 }
  0x3e   : > { %676 = dma.done.wait (%p787_p7), %s196_s18, 128  }
  0x3f   : > { %678 = vsyncadd (%p787_p7), %s196_s18, 4294967168 }
  0x40   : > { %680 = dma.done.wait (%p781_p3), [#allocation5], 64  }
  0x41   : > { %682 = vsyncadd (%p781_p3), [#allocation5], 4294967232 }
  0x42   : > { %684 = dma.done.wait (%p781_p3), [#allocation6], 16  }
  0x43   : > { %686 = vsyncadd (%p781_p3), [#allocation6], 4294967280 }
  0x44   : > { %212 = sfence }
  0x45   : > { %s235_s25 = sld [smem:[#allocation7]]  ;;  %v231_v0 = vld [vmem:[%s199_s26] sm:$0x3]  ;;  %v232_v1 = vld [vmem:[%s199_s26 + $0x2] sm:$0x3]  ;;  %p971_p7 = scmp.ne.s32.totalorder %s965_s23, 0 }
  0x46   : > { %s456_s29 = sld [smem:[#allocation7 + $0x1]]  ;;  %v873_v2 = vld [vmem:[%s199_s26 + $0x4] sm:$0x3]  ;;  %v875_v4 = vld [vmem:[%s199_s26 + $0x6] sm:$0x3] }
  0x47   : > { %s457_s27 = sld [smem:[#allocation7 + $0x2]] }
  0x48   : > { %s458_s6 = sld [smem:[#allocation7 + $0x3]] }
  0x49   : > { %s871_s22 = sld [smem:[#allocation8]] }
  0x4a   : > { %s459_s7 = sld [smem:[#allocation7 + $0x80]] }
  0x4b   : > { %v236_v3 = vstv %s235_s25  ;;  %s460_s8 = sld [smem:[#allocation7 + $0x81]] }
  0x4c   : > { %v237_v5 = vmul.f32 %v236_v3, %v231_v0  ;;  %v239_v6 = vstv %s456_s29  ;;  %s461_s21 = sld [smem:[#allocation7 + $0x82]] }
  0x4d   : > { %v240_v7 = vmul.f32 %v239_v6, %v232_v1  ;;  %v243_v8 = vstv %s457_s27  ;;  %s462_s9 = sld [smem:[#allocation7 + $0x83]] }
  0x4e   : > { %v244_v9 = vmul.f32 %v243_v8, %v873_v2  ;;  %v247_v10 = vstv %s458_s6  ;;  %s878_s28 = sld [smem:[#allocation8 + $0x1]]  ;;  %s890_s6 = scalar_lea.vmem [#allocation9], %s452_s1 }
  0x4f   : > { %v241_v11 = vadd.f32 %v240_v7, %v237_v5  ;;  %v248_v12 = vmul.f32 %v247_v10, %v875_v4  ;;  %s465_s10 = sld [smem:[#allocation7 + $0x100]]  ;;  %v251_v17 = vstv %s871_s22  ;;  %s333_s1 = sshll.u32 %s890_s6, 4  ;;  %s902_s1 = int_to_ptr.vmem [resolvable:$true] %s333_s1 }
  0x50   : > { %v256_v13 = vstv %s459_s7  ;;  %s466_s19 = sld [smem:[#allocation7 + $0x101]]  ;;  %s483_s7 = sshll.u32 %s705_s15, 7 }
  0x51   : > { %v245_v14 = vadd.f32 %v244_v9, %v241_v11  ;;  %v257_v15 = vmul.f32 %v256_v13, %v231_v0  ;;  %v259_v16 = vstv %s460_s8  ;;  %s467_s11 = sld [smem:[#allocation7 + $0x102]]  ;;  %s720_s15 = smov [#allocation9]  }
  0x52   : > { %v260_v18 = vmul.f32 %v259_v16, %v232_v1  ;;  %v263_v19 = vstv %s461_s21  ;;  %s468_s20 = sld [smem:[#allocation7 + $0x103]] }
  0x53   : > { %v249_v20 = vadd.f32 %v248_v12, %v245_v14  ;;  %v264_v21 = vmul.f32 %v263_v19, %v873_v2  ;;  %v267_v22 = vstv %s462_s9  ;;  %s883_s18 = sld [smem:[#allocation8 + $0x2]]  ;;  %s907_s9 = scalar_lea.hbm %s960_s3, %s483_s7 }
  0x54   : > { %v261_v23 = vadd.f32 %v260_v18, %v257_v15  ;;  %v268_v24 = vmul.f32 %v267_v22, %v875_v4  ;;  %s471_s26 = sld [smem:[#allocation7 + $0x180]]  ;;  %v271_v31 = vstv %s878_s28  ;;  %s319_s28 = scalar_lea.sflag [#allocation4], %s853_s4 }
  0x55   : > { %v252_v25 = vadd.f32 %v251_v17, %v249_v20  ;;  %v277_v26 = vstv %s465_s10  ;;  %s472_s25 = sld [smem:[#allocation7 + $0x181]]  ;;  %s625_s10 = scalar_lea.vmem %s902_s1, 128 }
  0x56   : > { %v265_v27 = vadd.f32 %v264_v21, %v261_v23  ;;  %v278_v28 = vmul.f32 %v277_v26, %v231_v0  ;;  %v280_v29 = vstv %s466_s19  ;;  %s473_s29 = sld [smem:[#allocation7 + $0x182]]  ;;  %p626_p3 = scmp.ne.s32.totalorder %s902_s1, %s625_s10 }
  0x57   : > { %v253_v30 = vadd.f32 %v252_v25, %v231_v0  ;;  %v281_v32 = vmul.f32 %v280_v29, %v232_v1  ;;  %v284_v33 = vstv %s467_s11  ;;  %s474_s27 = sld [smem:[#allocation7 + $0x183]]  ;;  %s629_s19 = sshll.u32 %s720_s15, 4  ;;  %s630_s19 = int_to_ptr.vmem [resolvable:$false] %s629_s19 }
  0x58   : > { %v269_v34 = vadd.f32 %v268_v24, %v265_v27  ;;  %v285_v35 = vmul.f32 %v284_v33, %v873_v2  ;;  %v288_v36 = vstv %s468_s20  ;;  %s475_s22 = sld [smem:[#allocation8 + $0x3]]  ;;  %p627_p13 = pnand %p626_p3, %p971_p7 }
  0x59   : > { %254 = vst [vmem:[%s890_s6] sm:$0x3] %v253_v30  ;;  %v282_v37 = vadd.f32 %v281_v32, %v278_v28  ;;  %v289_v38 = vmul.f32 %v288_v36, %v875_v4  ;;  %v292_v45 = vstv %s883_s18  ;;  %s631_s11 = scalar_lea.vmem %s630_s19, 256  ;;  %p632_p0 = scmp.lt.s32.totalorder %s902_s1, %s630_s19 }
  0x5a   : > { %v272_v39 = vadd.f32 %v271_v31, %v269_v34  ;;  %v298_v40 = vstv %s471_s26  ;;  %p628_p4 = pneg %p627_p13  ;;  %p633_p9 = scmp.lt.s32.totalorder %s631_s11, %s625_s10 }
  0x5b   : > { %v286_v41 = vadd.f32 %v285_v35, %v282_v37  ;;  %v299_v42 = vmul.f32 %v298_v40, %v231_v0  ;;  %v301_v43 = vstv %s472_s25 }
  0x5c   : > { %v273_v44 = vadd.f32 %v272_v39, %v232_v1  ;;  %v302_v46 = vmul.f32 %v301_v43, %v232_v1  ;;  %v305_v47 = vstv %s473_s29  ;;  %p634_p12 = por %p633_p9, %p632_p0 }
  0x5d   : > { %v290_v48 = vadd.f32 %v289_v38, %v286_v41  ;;  %v306_v49 = vmul.f32 %v305_v47, %v873_v2  ;;  %v309_v50 = vstv %s474_s27 }
  0x5e   : > { %464 = vst [vmem:[%s890_s6 + $0x2] sm:$0x3] %v273_v44  ;;  %v303_v51 = vadd.f32 %v302_v46, %v299_v42  ;;  %v310_v52 = vmul.f32 %v309_v50, %v875_v4  ;;  %v313_v56 = vstv %s475_s22  ;;  %p635_p2 = pnand %p634_p12, %p628_p4 }
  0x5f   : > { %v293_v53 = vadd.f32 %v292_v45, %v290_v48 }
  0x60   : > { %v307_v54 = vadd.f32 %v306_v49, %v303_v51 }
  0x61   : > { %v294_v55 = vadd.f32 %v293_v53, %v873_v2 }
  0x62   : > { %v311_v57 = vadd.f32 %v310_v52, %v307_v54 }
  0x63   : > { %470 = vst [vmem:[%s890_s6 + $0x4] sm:$0x3] %v294_v55 }
  0x64   : > { %v314_v58 = vadd.f32 %v313_v56, %v311_v57 }
  0x66   : > { %v315_v59 = vadd.f32 %v314_v58, %v875_v4 }
  0x68   : > { %476 = vst [vmem:[%s890_s6 + $0x6] sm:$0x3] %v315_v59 }
  0x69   : > { %638 = shalt.err (!%p635_p2)
}
  0x6a   : > { %s639_s20 = scalar_lea.hbm %s907_s9, 128  ;;  %s643_s25 = scalar_lea.hbm %s960_s3, 256 }
  0x6b   : > { %p640_p8 = scmp.ne.s32.totalorder %s907_s9, %s639_s20  ;;  %p644_p10 = scmp.lt.s32.totalorder %s907_s9, %s960_s3 }
  0x6c   : > { %p645_p11 = scmp.lt.s32.totalorder %s643_s25, %s639_s20 }
  0x6d   : > { %p641_p5 = pnand %p640_p8, %p971_p7 }
  0x6e   : > { %p646_p1 = por %p645_p11, %p644_p10 }
  0x6f   : > { %p642_p6 = pneg %p641_p5 }
  0x71   : > { %p647_p3 = pnand %p646_p1, %p642_p6 }
  0x73   : > { %650 = shalt.err (!%p647_p3)
}
  0x74   : > { %s721_s6 = smov 32   ;;  %s722_s22 = smov 2  }
  0x75   : > { %494 = dma.vmem_to_hbm [thread:$0]  (%p971_p7), %s902_s1, 128, %s907_s9, %s319_s28, %s721_s6, %s721_s6, %s722_s22  }
  0x76 PF: > { %s348_s7 = sand.u32 1, %s693_s12   ;;  %p972_p13 = scmp.ne.s32.totalorder %s966_s24, 0 }
  0x77   : > { %p973_p4 = scmp.ge.s32.totalorder %s713_s17, 2  ;;  %s349_s8 = scalar_lea.sflag [#allocation4], %s348_s7 }
  0x79   : > { %p508_p0 = pnand %p973_p4, %p972_p13 }
  0x7b   : > { %p509_p9 = pneg %p508_p0 }
  0x7d   : > { %688 = dma.done.wait (%p509_p9), %s349_s8, 128  }
  0x7e   : > { %690 = vsyncadd (%p509_p9), %s349_s8, 4294967168  ;;  %s21_s17 = sadd.s32 1, %s713_s17   ;;  %s974_s12 = smov %s697_s13 }
  0x7f   : > { %p18_p12 = scmp.ge.s32.totalorder %s21_s17, 4   ;;  %s975_s13 = smov %s701_s14 }
  0x80   : > { %s976_s14 = smov %s844_s30  ;;  %s977_s15 = smov %s709_s16 }
  0x81   : > { %s978_s16 = smov %s980_s5  ;;  %20 = sbr.rel (!%p18_p12) target bundleno = 10 (0xa), region = 90 }
  0x86   :  { %354 = vsyncpa [#allocation3], 1 }
  0x87   :  { %356 = vsyncpa [#allocation3 + $0x1], 1 }
  0x88   :  { %357 = vsyncpa [#allocation4], 1 }
  0x89   :  { %359 = vsyncpa [#allocation4 + $0x1], 1 }
  0x8a   :  { %360 = vsyncpa [#allocation5], 1 }
  0x8b   :  { %362 = vsyncpa [#allocation5 + $0x1], 1 }
  0x8c   :  { %363 = vsyncpa [#allocation6], 1 }
  0x8d   :  { %365 = vsyncpa [#allocation6 + $0x1], 1 }

</bundles_post_ra>
